<compile_context>
chip_gen: v7x
topology: tpu7x:2x2x1
jax: 0.10.0
libtpu: 0.0.40
codegen_flags: <defaults>
</compile_context>

<pallas_src>
import functools

import jax
import jax.numpy as jnp
import numpy as np
from jax.experimental import pallas as pl
from jax.experimental.pallas import tpu as pltpu


# ----------------------------- Pallas kernels -----------------------------

def groupnorm_stats_kernel(f_ref, sum_ref, sumsq_ref):
    """Pass 1: streaming per-(batch, channel) sum and sum-of-squares.

    f_ref:     (1, Cf, tile_n)      input tile (any float dtype)
    sum_ref:   (1, 1, Cf, 1) f32    running per-channel sum    (output-resident)
    sumsq_ref: (1, 1, Cf, 1) f32    running per-channel sumsq  (output-resident)

    Every tile is full (tile_n divides Npix by construction), so the glue can
    use Npix directly when finalizing the group statistics.
    """
    t = pl.program_id(2)
    x = f_ref[0].astype(jnp.float32)                 # (Cf, tile_n)
    s = jnp.sum(x, axis=1, keepdims=True)            # (Cf, 1)
    q = jnp.sum(x * x, axis=1, keepdims=True)        # (Cf, 1)

    @pl.when(t == 0)
    def _():
        sum_ref[0, 0] = s
        sumsq_ref[0, 0] = q

    @pl.when(t > 0)
    def _():
        sum_ref[0, 0] += s
        sumsq_ref[0, 0] += q


def spatial_norm_apply_kernel(f_ref, zq_ref, w_ref, bias_ref, o_ref, *, cf):
    """Pass 2: out = f * y' + b' with GroupNorm affine folded into the convs.

    f_ref:    (1, Cf, tile_n)       feature tile (native dtype)
    zq_ref:   (1, Czq, tile_n)      zq tile (already nearest-resized to f grid)
    w_ref:    (1, 2*Cf, Czq)        per-batch folded weights [s.Wy ; t.Wy+Wb]
    bias_ref: (1, 2*Cf, 1)   f32    per-batch folded biases  [s*by ; t*by+bb]
    o_ref:    (1, Cf, tile_n)       output, same dtype as f
    """
    f = f_ref[0]                                                    # (Cf, tile_n)
    zq = zq_ref[0]                                                  # (Czq, tile_n)

    # y' = (diag(s) Wy) @ zq + s*by   -- native-dtype MXU matmul, f32 accumulate.
    y = jnp.dot(w_ref[0, :cf, :], zq, preferred_element_type=jnp.float32)
    y = y + bias_ref[0, :cf, :]
    out = f.astype(jnp.float32) * y                                 # y dead after this

    # b' = (diag(t) Wy + Wb) @ zq + t*by + bb
    b = jnp.dot(w_ref[0, cf:, :], zq, preferred_element_type=jnp.float32)
    out = out + (b + bias_ref[0, cf:, :])

    o_ref[0] = out.astype(o_ref.dtype)


# ------------------------------- glue -------------------------------------

def _nearest_axis(x, axis, new_size):
    """PyTorch 'nearest' resize along one axis.

    Integral upscale -> broadcast+reshape (no gather); otherwise index gather
    with src = floor(dst * old / new).
    """
    old = x.shape[axis]
    if new_size == old:
        return x
    if old > 0 and new_size % old == 0:
        r = new_size // old
        x = jnp.expand_dims(x, axis + 1)
        bshape = list(x.shape)
        bshape[axis + 1] = r
        x = jnp.broadcast_to(x, tuple(bshape))
        oshape = list(x.shape)
        oshape[axis] = new_size
        del oshape[axis + 1]
        return x.reshape(tuple(oshape))
    idx = (jnp.arange(new_size) * old) // new_size
    return jnp.take(x, idx, axis=axis)


def nearest_interp_3d(x, size):
    """PyTorch F.interpolate(mode='nearest') for NCDHW tensors."""
    tn, hn, wn = size
    x = _nearest_axis(x, 2, tn)
    x = _nearest_axis(x, 3, hn)
    x = _nearest_axis(x, 4, wn)
    return x


def resize_zq_like_f(zq, f_shape):
    """Replicates the rank-0 / enable_cp path of SpatialNorm3D.forward."""
    t_f, h_f, w_f = f_shape[-3:]
    if t_f > 1 and zq.shape[2] > 1:
        zq_first = nearest_interp_3d(zq[:, :, :1], (1, h_f, w_f))
        zq_rest = nearest_interp_3d(zq[:, :, 1:], (t_f - 1, h_f, w_f))
        return jnp.concatenate([zq_first, zq_rest], axis=2)
    return nearest_interp_3d(zq, (t_f, h_f, w_f))


def _pick_tile(npix, max_tile):
    """Largest divisor of npix <= max_tile, preferring lane-dense mult. of 128.

    Always returns a divisor of npix (no partial tiles), so the stats kernel's
    full-tile assumption holds.  For awkward Npix with no multiple-of-128
    divisor this falls back to the largest (possibly lane-masked) divisor that
    still fits the VMEM budget instead of one enormous block.
    """
    max_tile = max(128, min(npix, max_tile))
    best_lane_dense = None
    best_any = 1
    d = 1
    while d * d <= npix:
        if npix % d == 0:
            for cand in (d, npix // d):
                if cand <= max_tile:
                    best_any = max(best_any, cand)
                    if cand % 128 == 0:
                        best_lane_dense = max(best_lane_dense or 0, cand)
        d += 1
    return best_lane_dense if best_lane_dense is not None else best_any


def _vmem_config():
    """(vmem_limit_bytes, per-pass block budget bytes) per TPU generation."""
    try:
        kind = jax.devices()[0].device_kind.lower()
    except Exception:  # pragma: no cover - defensive
        kind = ""
    if "v7" in kind:                 # 64 MiB physical VMEM (32 MiB scoped default)
        return 48 << 20, 12 << 20
    if "v6" in kind:                 # 128 MiB physical: big tiles amortize step cost
        return 96 << 20, 32 << 20
    if "v5 lite" in kind or "v5e" in kind:   # 128 MiB physical, 16 MiB scoped default
        return 64 << 20, 16 << 20
    return 48 << 20, 12 << 20        # conservative default (v4 / unknown)


def spatial_norm_3d(f, zq, params, *, num_groups, eps=1e-6,
                    max_tile_npix=None, vmem_limit_bytes=None):
    """f: (B, C_f, T, H, W), zq: (B, C_zq, T', H', W') -> (B, C_f, T, H, W)."""
    B, Cf, T, H, W = f.shape
    Czq = zq.shape[1]
    npix = T * H * W
    assert Cf % num_groups == 0
    cpg = Cf // num_groups

    # ---- per-generation tile / VMEM sizing --------------------------------
    vmem_cap, block_budget = _vmem_config()
    if vmem_limit_bytes is None:
        vmem_limit_bytes = vmem_cap
    esz = f.dtype.itemsize
    zsz = zq.dtype.itemsize
    # Pass-2 per-pixel footprint: double-buffered f/out/zq blocks + ~2 live
    # f32 temporaries (y|b and out) inside the kernel.
    bytes_per_pixel = 2 * (2 * Cf * esz + Czq * zsz) + 2 * Cf * 4
    budget_tile = max(128, (block_budget // bytes_per_pixel) // 128 * 128)
    if max_tile_npix is None:
        max_tile_npix = budget_tile
    else:
        max_tile_npix = min(max_tile_npix, budget_tile)
    tile_n = _pick_tile(npix, max_tile_npix)
    n_tiles = npix // tile_n

    # ---- zq nearest upsample (glue, broadcast/reshape for integral factors) --
    # TODO(synk): fuse this expand into the apply kernel (zq VMEM-resident at
    # native resolution) to remove the extra Czq*Npix HBM write+read.
    zq_r = resize_zq_like_f(zq, f.shape)

    # NCDHW -> (B, C, Npix): contiguous reshape, no transpose / no HBM pass.
    f_flat = f.reshape(B, Cf, npix)
    zq_flat = zq_r.reshape(B, Czq, npix)

    # ---------------- pass 1: streaming per-channel sum / sumsq -------------
    # Leading split axis lets the reduction shard across both v7x TensorCores.
    n_split = 2 if (n_tiles % 2 == 0 and n_tiles >= 2) else 1
    tps = n_tiles // n_split

    sum_p, sumsq_p = pl.pallas_call(
        groupnorm_stats_kernel,
        out_shape=(jax.ShapeDtypeStruct((n_split, B, Cf, 1), jnp.float32),
                   jax.ShapeDtypeStruct((n_split, B, Cf, 1), jnp.float32)),
        grid_spec=pltpu.PrefetchScalarGridSpec(
            num_scalar_prefetch=0,
            grid=(n_split, B, tps),
            in_specs=[pl.BlockSpec((1, Cf, tile_n),
                                   lambda s, b, t: (b, 0, s * tps + t))],
            out_specs=[pl.BlockSpec((1, 1, Cf, 1), lambda s, b, t: (s, b, 0, 0)),
                       pl.BlockSpec((1, 1, Cf, 1), lambda s, b, t: (s, b, 0, 0))],
        ),
        compiler_params=pltpu.CompilerParams(
            dimension_semantics=("parallel", "parallel", "arbitrary"),
            vmem_limit_bytes=vmem_limit_bytes),
    )(f_flat)

    # ---------------- tiny per-batch finalize + weight fold (glue) ----------
    sum_c = jnp.sum(sum_p, axis=0)[..., 0]          # (B, Cf)
    sumsq_c = jnp.sum(sumsq_p, axis=0)[..., 0]      # (B, Cf)

    n_per_group = float(cpg * npix)
    sum_g = jnp.sum(sum_c.reshape(B, num_groups, cpg), axis=2)      # (B, G)
    sumsq_g = jnp.sum(sumsq_c.reshape(B, num_groups, cpg), axis=2)  # (B, G)
    mean_g = sum_g / n_per_group
    var_g = jnp.maximum(sumsq_g / n_per_group - mean_g * mean_g, 0.0)  # biased
    inv_g = jax.lax.rsqrt(var_g + eps)                               # (B, G)

    mean_c = jnp.repeat(mean_g, cpg, axis=1)                         # (B, Cf)
    inv_c = jnp.repeat(inv_g, cpg, axis=1)                           # (B, Cf)
    gamma = params["gamma"].astype(jnp.float32)[None]                # (1, Cf)
    beta = params["beta"].astype(jnp.float32)[None]
    scale_c = gamma * inv_c                                          # s  (B, Cf)
    shift_c = beta - mean_c * scale_c                                # t  (B, Cf)

    wy = params["wy"].astype(jnp.float32)                            # (Cf, Czq)
    wb = params["wb"].astype(jnp.float32)
    by = params["by"].astype(jnp.float32)                            # (Cf,)
    bb = params["bb"].astype(jnp.float32)

    # out = (f*s + t)*(Wy zq + by) + (Wb zq + bb)
    #     = f*[(s.Wy) zq + s*by] + [(t.Wy + Wb) zq + t*by + bb]
    w_y = scale_c[:, :, None] * wy[None]                             # (B, Cf, Czq)
    w_b = shift_c[:, :, None] * wy[None] + wb[None]                  # (B, Cf, Czq)
    b_y = scale_c * by[None]                                         # (B, Cf)
    b_b = shift_c * by[None] + bb[None]                              # (B, Cf)

    w_fused = jnp.concatenate([w_y, w_b], axis=1).astype(f.dtype)    # (B, 2Cf, Czq)
    bias_fused = jnp.concatenate([b_y, b_b], axis=1)[..., None]      # (B, 2Cf, 1) f32

    # ---------------- pass 2: apply folded norm + fused 1x1x1 convs ----------
    out_flat = pl.pallas_call(
        functools.partial(spatial_norm_apply_kernel, cf=Cf),
        out_shape=jax.ShapeDtypeStruct((B, Cf, npix), f.dtype),
        grid_spec=pltpu.PrefetchScalarGridSpec(
            num_scalar_prefetch=0,
            grid=(B, n_tiles),
            in_specs=[
                pl.BlockSpec((1, Cf, tile_n), lambda b, t: (b, 0, t)),    # f
                pl.BlockSpec((1, Czq, tile_n), lambda b, t: (b, 0, t)),   # zq (resized)
                pl.BlockSpec((1, 2 * Cf, Czq), lambda b, t: (b, 0, 0)),   # folded W
                pl.BlockSpec((1, 2 * Cf, 1), lambda b, t: (b, 0, 0)),     # folded bias
            ],
            out_specs=pl.BlockSpec((1, Cf, tile_n), lambda b, t: (b, 0, t)),
        ),
        compiler_params=pltpu.CompilerParams(
            dimension_semantics=("parallel", "parallel"),
            vmem_limit_bytes=vmem_limit_bytes),
    )(f_flat, zq_flat, w_fused, bias_fused)
    # NOTE: if profiling shows exposed DMA at small v7x tiles, add
    # pipeline_mode=pl.Buffered(3) to the f/zq in_specs instead of growing tile_n.

    return out_flat.reshape(B, Cf, T, H, W)


# --------------------------- pure-JAX reference ----------------------------

def spatial_norm_3d_ref(f, zq, params, *, num_groups, eps=1e-6):
    B, Cf, T, H, W = f.shape
    zq_r = resize_zq_like_f(zq, f.shape)
    fr = f.reshape(B, num_groups, Cf // num_groups, T, H, W)
    mean = fr.mean(axis=(2, 3, 4, 5), keepdims=True)
    var = ((fr - mean) ** 2).mean(axis=(2, 3, 4, 5), keepdims=True)
    fn = ((fr - mean) / jnp.sqrt(var + eps)).reshape(B, Cf, T, H, W)
    fn = fn * params["gamma"][None, :, None, None, None] \
         + params["beta"][None, :, None, None, None]
    y = jnp.einsum("bcthw,oc->bothw", zq_r, params["wy"]) \
        + params["by"][None, :, None, None, None]
    bb = jnp.einsum("bcthw,oc->bothw", zq_r, params["wb"]) \
        + params["bb"][None, :, None, None, None]
    return fn * y + bb


# --------------------------------- main ------------------------------------

if __name__ == "__main__":
    # f : (B, f_channels, T, H, W), zq : (B, zq_channels, T', H', W')
    # npix = 3*16*16 = 768: the 128-pixel tile run exercises the multi-tile
    # streaming-stats path with the 2-way core split; the default-tile run
    # exercises the single-tile path.  T > 1 exercises the first-frame split.
    B, Cf, Czq = 2, 8, 4
    T, H, W = 3, 16, 16
    Tz, Hz, Wz = 2, 8, 8
    num_groups, eps = 2, 1e-6

    key = jax.random.PRNGKey(0)
    kf, kz, kg, kb, kwy, kby, kwb, kbb = jax.random.split(key, 8)

    f = jax.random.normal(kf, (B, Cf, T, H, W), dtype=jnp.float32)
    zq = jax.random.normal(kz, (B, Czq, Tz, Hz, Wz), dtype=jnp.float32)

    params = {
        "gamma": 1.0 + 0.1 * jax.random.normal(kg, (Cf,), dtype=jnp.float32),
        "beta": 0.1 * jax.random.normal(kb, (Cf,), dtype=jnp.float32),
        # conv_y / conv_b: PyTorch weight (Cf, Czq, 1, 1, 1) -> (Cf, Czq).
        "wy": 0.2 * jax.random.normal(kwy, (Cf, Czq), dtype=jnp.float32),
        "by": 0.1 * jax.random.normal(kby, (Cf,), dtype=jnp.float32),
        "wb": 0.2 * jax.random.normal(kwb, (Cf, Czq), dtype=jnp.float32),
        "bb": 0.1 * jax.random.normal(kbb, (Cf,), dtype=jnp.float32),
    }

    ref = spatial_norm_3d_ref(f, zq, params, num_groups=num_groups, eps=eps)

    # --- f32 path, forced small tile: multi-tile stats + 2-way split ---
    out = spatial_norm_3d(f, zq, params, num_groups=num_groups, eps=eps,
                          max_tile_npix=128)
    out = jax.block_until_ready(out)
    np.testing.assert_allclose(np.asarray(out), np.asarray(ref),
                               rtol=1e-4, atol=1e-4)

    # --- bf16 streaming path, auto tile (single lane-dense tile) ---
    f_bf = f.astype(jnp.bfloat16)
    zq_bf = zq.astype(jnp.bfloat16)
    out_bf = spatial_norm_3d(f_bf, zq_bf, params, num_groups=num_groups, eps=eps)
    out_bf = jax.block_until_ready(out_bf)
    assert out_bf.dtype == jnp.bfloat16
    ref_bf = spatial_norm_3d_ref(f_bf.astype(jnp.float32),
                                 zq_bf.astype(jnp.float32),
                                 params, num_groups=num_groups, eps=eps)
    np.testing.assert_allclose(np.asarray(out_bf.astype(jnp.float32)),
                               np.asarray(ref_bf), rtol=5e-2, atol=5e-2)

    print("KERNEL_OK")
</pallas_src>

<mosaic_0001>
module attributes {stable_mosaic.version = 11 : i64} {
  func.func @groupnorm_stats_kernel(%arg0: i32, %arg1: i32, %arg2: i32, %arg3: memref<1x8x128xf32, #tpu.memory_space<vmem>>, %arg4: memref<1x1x8x1xf32, #tpu.memory_space<vmem>>, %arg5: memref<1x1x8x1xf32, #tpu.memory_space<vmem>>) attributes {dimension_semantics = [#tpu.dimension_semantics<parallel>, #tpu.dimension_semantics<parallel>, #tpu.dimension_semantics<arbitrary>], iteration_bounds = array<i64: 2, 2, 3>, scalar_prefetch = 0 : i64, scratch_operands = 0 : i64, tpu.core_type = #tpu.core_type<tc>, window_params = [{transform_indices = @transform_0, window_bounds = array<i64: 1, 8, 128>}, {transform_indices = @transform_1, window_bounds = array<i64: 1, 1, 8, 1>}, {transform_indices = @transform_2, window_bounds = array<i64: 1, 1, 8, 1>}]} {
    %c0 = arith.constant 0 : index
    %c0_0 = arith.constant 0 : index
    %c0_1 = arith.constant 0 : index
    %0 = vector.load %arg3[%c0, %c0_0, %c0_1] : memref<1x8x128xf32, #tpu.memory_space<vmem>>, vector<1x8x128xf32>
    %1 = vector.shape_cast %0 : vector<1x8x128xf32> to vector<8x128xf32>
    %cst = arith.constant dense<0.000000e+00> : vector<8xf32>
    %2 = vector.multi_reduction <add>, %1, %cst [1] : vector<8x128xf32> to vector<8xf32>
    %3 = vector.shape_cast %2 : vector<8xf32> to vector<8x1xf32>
    %4 = arith.mulf %1, %1 : vector<8x128xf32>
    %cst_2 = arith.constant dense<0.000000e+00> : vector<8xf32>
    %5 = vector.multi_reduction <add>, %4, %cst_2 [1] : vector<8x128xf32> to vector<8xf32>
    %6 = vector.shape_cast %5 : vector<8xf32> to vector<8x1xf32>
    %c0_i32 = arith.constant 0 : i32
    %7 = arith.cmpi eq, %arg2, %c0_i32 : i32
    %8 = arith.extui %7 : i1 to i32
    %c0_i32_3 = arith.constant 0 : i32
    %9 = arith.cmpi ne, %8, %c0_i32_3 : i32
    scf.if %9 {
      %c0_6 = arith.constant 0 : index
      %c0_7 = arith.constant 0 : index
      %c0_8 = arith.constant 0 : index
      %c0_9 = arith.constant 0 : index
      %13 = vector.load %arg4[%c0_6, %c0_7, %c0_8, %c0_9] : memref<1x1x8x1xf32, #tpu.memory_space<vmem>>, vector<1x1x8x1xf32>
      %14 = vector.shape_cast %13 : vector<1x1x8x1xf32> to vector<8x1xf32>
      %15 = vector.shape_cast %3 : vector<8x1xf32> to vector<1x1x8x1xf32>
      tpu.vector_store %arg4[%c0_6, %c0_7, %c0_8, %c0_9], %15 {strides = array<i32>} : memref<1x1x8x1xf32, #tpu.memory_space<vmem>>, vector<1x1x8x1xf32>,
      %c0_10 = arith.constant 0 : index
      %c0_11 = arith.constant 0 : index
      %c0_12 = arith.constant 0 : index
      %c0_13 = arith.constant 0 : index
      %16 = vector.load %arg5[%c0_10, %c0_11, %c0_12, %c0_13] : memref<1x1x8x1xf32, #tpu.memory_space<vmem>>, vector<1x1x8x1xf32>
      %17 = vector.shape_cast %16 : vector<1x1x8x1xf32> to vector<8x1xf32>
      %18 = vector.shape_cast %6 : vector<8x1xf32> to vector<1x1x8x1xf32>
      tpu.vector_store %arg5[%c0_10, %c0_11, %c0_12, %c0_13], %18 {strides = array<i32>} : memref<1x1x8x1xf32, #tpu.memory_space<vmem>>, vector<1x1x8x1xf32>,
    } else {
    }
    %c0_i32_4 = arith.constant 0 : i32
    %10 = arith.cmpi sgt, %arg2, %c0_i32_4 : i32
    %11 = arith.extui %10 : i1 to i32
    %c0_i32_5 = arith.constant 0 : i32
    %12 = arith.cmpi ne, %11, %c0_i32_5 : i32
    scf.if %12 {
      %c0_6 = arith.constant 0 : index
      %c0_7 = arith.constant 0 : index
      %c0_8 = arith.constant 0 : index
      %c0_9 = arith.constant 0 : index
      %13 = vector.load %arg4[%c0_6, %c0_7, %c0_8, %c0_9] : memref<1x1x8x1xf32, #tpu.memory_space<vmem>>, vector<1x1x8x1xf32>
      %14 = vector.shape_cast %13 : vector<1x1x8x1xf32> to vector<8x1xf32>
      %15 = arith.addf %14, %3 : vector<8x1xf32>
      %c0_10 = arith.constant 0 : index
      %c0_11 = arith.constant 0 : index
      %c0_12 = arith.constant 0 : index
      %c0_13 = arith.constant 0 : index
      %16 = vector.load %arg4[%c0_10, %c0_11, %c0_12, %c0_13] : memref<1x1x8x1xf32, #tpu.memory_space<vmem>>, vector<1x1x8x1xf32>
      %17 = vector.shape_cast %16 : vector<1x1x8x1xf32> to vector<8x1xf32>
      %18 = vector.shape_cast %15 : vector<8x1xf32> to vector<1x1x8x1xf32>
      tpu.vector_store %arg4[%c0_10, %c0_11, %c0_12, %c0_13], %18 {strides = array<i32>} : memref<1x1x8x1xf32, #tpu.memory_space<vmem>>, vector<1x1x8x1xf32>,
      %c0_14 = arith.constant 0 : index
      %c0_15 = arith.constant 0 : index
      %c0_16 = arith.constant 0 : index
      %c0_17 = arith.constant 0 : index
      %19 = vector.load %arg5[%c0_14, %c0_15, %c0_16, %c0_17] : memref<1x1x8x1xf32, #tpu.memory_space<vmem>>, vector<1x1x8x1xf32>
      %20 = vector.shape_cast %19 : vector<1x1x8x1xf32> to vector<8x1xf32>
      %21 = arith.addf %20, %6 : vector<8x1xf32>
      %c0_18 = arith.constant 0 : index
      %c0_19 = arith.constant 0 : index
      %c0_20 = arith.constant 0 : index
      %c0_21 = arith.constant 0 : index
      %22 = vector.load %arg5[%c0_18, %c0_19, %c0_20, %c0_21] : memref<1x1x8x1xf32, #tpu.memory_space<vmem>>, vector<1x1x8x1xf32>
      %23 = vector.shape_cast %22 : vector<1x1x8x1xf32> to vector<8x1xf32>
      %24 = vector.shape_cast %21 : vector<8x1xf32> to vector<1x1x8x1xf32>
      tpu.vector_store %arg5[%c0_18, %c0_19, %c0_20, %c0_21], %24 {strides = array<i32>} : memref<1x1x8x1xf32, #tpu.memory_space<vmem>>, vector<1x1x8x1xf32>,
    } else {
    }
    return
  }
  func.func @transform_0(%arg0: i32, %arg1: i32, %arg2: i32) -> (i32, i32, i32) {
    %c3_i32 = arith.constant 3 : i32
    %0 = arith.muli %arg0, %c3_i32 : i32
    %1 = arith.addi %0, %arg2 : i32
    %c0_i32 = arith.constant 0 : i32
    %c0_i32_0 = arith.constant 0 : i32
    return %arg1, %c0_i32, %1 : i32, i32, i32
  }
  func.func @transform_1(%arg0: i32, %arg1: i32, %arg2: i32) -> (i32, i32, i32, i32) {
    %c0_i32 = arith.constant 0 : i32
    %c0_i32_0 = arith.constant 0 : i32
    %c0_i32_1 = arith.constant 0 : i32
    return %arg0, %arg1, %c0_i32, %c0_i32_0 : i32, i32, i32, i32
  }
  func.func @transform_2(%arg0: i32, %arg1: i32, %arg2: i32) -> (i32, i32, i32, i32) {
    %c0_i32 = arith.constant 0 : i32
    %c0_i32_0 = arith.constant 0 : i32
    %c0_i32_1 = arith.constant 0 : i32
    return %arg0, %arg1, %c0_i32, %c0_i32_0 : i32, i32, i32, i32
  }
}

</mosaic_0001>

<bundles_post_ra>
// kernel: tpu_custom_call.1
= control target key start
LH: loop header
LB: loop body
LE: loop exit
PB: predicated region body
PF: predicated region fallthrough
CT: control target
= control target key end

     0   :  { %8 = vsyncpa [#allocation3], 0  ;;  %s805_s0 = inlined_call_operand.hbm [shape: f32[2,8,768], index: 0, kind: input, shape index: {}]   ;;  %s806_s1 = inlined_call_operand.vmem [shape: f32[2,2,8,1], index: 1, kind: output, shape index: {0}]   ;;  %s807_s2 = inlined_call_operand.vmem [shape: f32[2,2,8,1], index: 2, kind: output, shape index: {1}]  }
   0x1   :  { %10 = vsyncpa [#allocation3 + $0x1], 0  ;;  %s628_s9 = smov 0   ;;  %s630_s10 = smov 0  }
   0x2   :  { %s632_s11 = smov 0   ;;  %s634_s12 = smov 0  }
   0x3   :  { %s636_s13 = smov 0   ;;  %s638_s14 = smov 0  }
   0x4   :  { %s640_s15 = smov 0   ;;  %s642_s16 = smov 0  }
   0x5   :  { %s644_s17 = smov 0   ;;  %s646_s18 = smov 0  }
   0x6 LB: > { %811 = sst [smem:[#allocation5_spill]] %s598_s15  ;;  %s394_s19 = sadd.s32 4294967295, %s610_s18   ;;  %s610_s18 = sphi %s646_s18, %s16_s18   ;;  %s606_s17 = sphi %s644_s17, %s826_s17   ;;  %s602_s16 = sphi %s642_s16, %s825_s16   ;;  %s598_s15 = sphi %s640_s15, %s824_s15   ;;  %s594_s14 = sphi %s638_s14, %s818_s14   ;;  %s590_s13 = sphi %s636_s13, %s823_s13   ;;  %s586_s12 = sphi %s634_s12, %s817_s12   ;;  %s582_s11 = sphi %s632_s11, %s822_s11   ;;  %s578_s10 = sphi %s630_s10, %s821_s10   ;;  %s574_s9 = sphi %s628_s9, %s820_s9  }
   0x7   : > { %812 = sst [smem:[#allocation6_spill]] %s606_s17  ;;  %s28_s20 = sadd.s32 1, %s598_s15 }
   0x8   : > { %p29_p0 = scmp.ge.s32.totalorder %s28_s20, 3  ;;  %s31_s21 = sadd.s32 1, %s602_s16 }
   0x9   : > { %s35_s22 = sadd.s32 1, %s606_s17  ;;  %s39_s23 = smul.u32 3, %s606_s17 }
   0xa   : > { %s828_s20 = smov (%p29_p0, %s28_s20), 0  ;;  %s830_s21 = smov (!%p29_p0, %s31_s21), %s602_s16 }
   0xb   : > { %s40_s24 = sadd.s32 %s598_s15, %s39_s23  ;;  %s48_s25 = sadd.s32 1, %s582_s11 }
   0xc   : > { %p33_p1 = scmp.ge.s32.totalorder %s830_s21, 2  ;;  %p55_p2 = scmp.ne.s32.totalorder %s582_s11, %s578_s10 }
   0xd   : > { %p56_p3 = scmp.eq.s32.totalorder %s610_s18, 0  ;;  %p61_p4 = scmp.ne.s32.totalorder %s578_s10, %s574_s9 }
   0xe   : > { %s832_s21 = smov (%p33_p1, %s830_s21), 0  ;;  %s834_s22 = smov (!%p33_p1, %s35_s22), %s606_s17 }
   0xf   : > { %813 = sst [smem:[#allocation7_spill]] %s832_s21  ;;  %s43_s26 = ssub.s32 %s602_s16, %s832_s21 }
  0x10   : > { %p698_p5 = por %p56_p3, %p55_p2  ;;  %p37_p6 = scmp.ge.s32.totalorder %s834_s22, 2 }
  0x11   : > { %p62_p7 = scmp.eq.s32.totalorder %s394_s19, 0  ;;  %p417_p8 = scmp.lt.s32.totalorder %s610_s18, 12 }
  0x12   : > { %s836_s22 = smov (%p37_p6, %s834_s22), 0  ;;  %s141_s29 = sand.u32 1, %s582_s11  }
  0x13   : > { %p705_p9 = por %p62_p7, %p61_p4  ;;  %s41_s30 = smul.u32 3, %s836_s22 }
  0x14   : > { %s398_s3 = sshll.u32 %s141_s29, 3  ;;  %s410_s4 = smul.u32 6, %s602_s16 }
  0x15   : > { %s42_s5 = sadd.s32 %s41_s30, %s828_s20  ;;  %s145_s17 = scalar_lea.vmem [#allocation2], %s398_s3 }
  0x16   : > { %s44_s6 = ssub.s32 %s40_s24, %s42_s5  ;;  %s152_s7 = sadd.s32 %s410_s4, %s40_s24 }
  0x17   : > { %s45_s8 = sor.u32 %s44_s6, %s43_s26  ;;  %s399_s9 = sshll.u32 %s152_s7, 7 }
  0x18   : > { %p46_p10 = scmp.eq.s32.totalorder %s45_s8, 0  ;;  %s716_s21 = scalar_lea.hbm %s805_s0, %s399_s9 }
  0x19   : > { %s156_s15 = sshll.u32 %s145_s17, 4  ;;  %p722_p11 = pnand %p417_p8, %p698_p5  ;;  %s729_s15 = int_to_ptr.vmem [resolvable:$true] %s156_s15 }
  0x1a   : > { %s727_s24 = scalar_select %p46_p10, %s582_s11, %s48_s25  }
  0x1b   : > { %s142_s26 = scalar_lea.sflag [#allocation3], %s141_s29  ;;  %s498_s4 = scalar_lea.hbm %s716_s21, 128 }
  0x1c   : > { %p499_p12 = scmp.ne.s32.totalorder %s716_s21, %s498_s4  ;;  %p500_p13 = pneg %p722_p11 }
  0x1d   : > { %s503_s3 = scalar_lea.hbm %s805_s0, 1536  ;;  %p504_p2 = scmp.lt.u32.totalorder %s716_s21, %s805_s0 }
  0x1e   : > { %p501_p0 = pnand %p500_p13, %p499_p12  ;;  %p505_p3 = scmp.lt.u32.totalorder %s503_s3, %s498_s4 }
  0x1f   : > { %p507_p5 = scmp.lt.u32.totalorder %s498_s4, %s716_s21 }
  0x20   : > { %p502_p1 = pneg %p501_p0  ;;  %p506_p4 = por %p505_p3, %p504_p2 }
  0x22   : > { %p508_p6 = por %p507_p5, %p506_p4 }
  0x24   : > { %p509_p7 = pnand %p508_p6, %p502_p1 }
  0x26   : > { %512 = shalt.err (!%p509_p7)
}
  0x27   : > { %s513_s25 = scalar_lea.vmem %s729_s15, 128  ;;  %s612_s29 = smov [#allocation2]  }
  0x28   : > { %p514_p8 = scmp.ne.s32.totalorder %s729_s15, %s513_s25  ;;  %s518_s7 = sshll.u32 %s612_s29, 4  ;;  %s519_s7 = int_to_ptr.vmem [resolvable:$false] %s518_s7 }
  0x29   : > { %s520_s8 = scalar_lea.vmem %s519_s7, 256  ;;  %p521_p0 = scmp.lt.s32.totalorder %s729_s15, %s519_s7 }
  0x2a   : > { %p516_p10 = pnand %p514_p8, %p500_p13  ;;  %p522_p2 = scmp.lt.s32.totalorder %s520_s8, %s513_s25 }
  0x2c   : > { %p517_p12 = pneg %p516_p10  ;;  %p523_p3 = por %p522_p2, %p521_p0 }
  0x2e   : > { %p524_p4 = pnand %p523_p3, %p517_p12 }
  0x30   : > { %527 = shalt.err (!%p524_p4)
}
  0x31   : > { %416 = dma.hbm_to_vmem [thread:$0]  (!%p722_p11), %s716_s21, 128, %s729_s15, %s142_s26  }
  0x32   : > { %p400_p1 = scmp.ge.s32.totalorder %s610_s18, 1  ;;  %p161_p5 = scmp.lt.s32.totalorder %s610_s18, 13 }
  0x34   : > { %p162_p13 = pnand %p400_p1, %p161_p5 }
  0x35   : > { %s167_s9 = sand.u32 (!%p162_p13), 1, %s578_s10  }
  0x36   : > { %165 = sbr.rel (%p162_p13) target bundleno = 220 (0xdc), region = 24  ;;  %s401_s19 = sshll.u32 (!%p162_p13), %s167_s9, 3 }
  0x37   : > { %s168_s23 = scalar_lea.sflag (!%p162_p13), [#allocation3], %s167_s9  ;;  %s171_s4 = scalar_lea.vmem (!%p162_p13), [#allocation2], %s401_s19 }
  0x3d   : > { %569 = dma.done.wait (%p705_p9), %s168_s23, 128  }
  0x3e   : > { %571 = vsyncadd (%p705_p9), %s168_s23, 4294967168  ;;  %v221_v0 = vld [vmem:[%s171_s4] sm:$0xff]  ;;  %p205_p11 = scmp.lt.s32.totalorder %s594_s14, 1  ;;  %p207_p6 = scmp.lt.s32.totalorder %s590_s13, 1 }
  0x3f   : > { %222 = vadd.xlane.f32.xlu0 %v221_v0  ;;  %v224_v1 = vmul.f32 %v221_v0, %v221_v0  ;;  %p406_p9 = scmp.ne.s32.totalorder %s586_s12, 0 }
  0x40   : > { %s838_s14 = smov (!%p205_p11, %s594_s14), 1  ;;  %s840_s13 = smov (!%p207_p6, %s590_s13), 1 }
  0x41   : > { %s402_s15 = sshll.u32 %s838_s14, 1  ;;  %vm231_vm0 = vcmask (!%p406_p9), 7168  }
  0x42   : > { %s210_s21 = sadd.s32 %s402_s15, %s840_s13 }
  0x43   : > { %225 = vadd.xlane.f32.xlu0 %v224_v1  ;;  %s403_s30 = sshll.u32 %s210_s21, 3 }
  0x44   : > { %s212_s28 = scalar_lea.vmem %s806_s1, %s403_s30  ;;  %s220_s5 = scalar_lea.vmem %s807_s2, %s403_s30 }
  0xca   : > { %230 = sbr.rel (%p406_p9) target bundleno = 210 (0xd2), region = 32 }
  0xcc   : > { %v223_v2 = vpop.xlane.xlu0 %222 }
  0xcd   : > { %232 = vst.msk [vmem:[%s212_s28] sm:$0xff] (!%p406_p9), %vm231_vm0, %v223_v2 }
  0xd0   : > { %v226_v3 = vpop.xlane.xlu0 %225 }
  0xd1   : > { %233 = vst.msk [vmem:[%s220_s5] sm:$0xff] %vm231_vm0, %v226_v3 }
  0xd2 PF: > { %p407_p7 = scmp.le.s32.totalorder %s586_s12, 0 }
  0xd3   : > { %vm240_vm1 = vcmask (!%p407_p7), 7168  }
  0xd4   : > { %237 = sbr.rel (%p407_p7) target bundleno = 220 (0xdc), region = 36 }
  0xd5   : > { %v238_v4 = vld [vmem:[%s212_s28] sm:$0xff] (!%p407_p7) }
  0xd6   : > { %v239_v6 = vadd.f32 (!%p407_p7), %v238_v4, %v223_v2 }
  0xd8   : > { %v242_v5 = vld [vmem:[%s220_s5] sm:$0xff] (!%p407_p7)  ;;  %241 = vst.msk [vmem:[%s212_s28] sm:$0xff] (!%p407_p7), %vm240_vm1, %v239_v6 }
  0xd9   : > { %v243_v7 = vadd.f32 (!%p407_p7), %v242_v5, %v226_v3 }
  0xdb   : > { %244 = vst.msk [vmem:[%s220_s5] sm:$0xff] %vm240_vm1, %v243_v7 }
  0xdc PF: > { %s16_s18 = sadd.s32 1, %s610_s18   ;;  %s817_s12 = sld [smem:[#allocation5_spill]] }
  0xdd   : > { %p13_p8 = scmp.ge.s32.totalorder %s16_s18, 14   ;;  %s818_s14 = sld [smem:[#allocation6_spill]] }
  0xde   : > { %s819_s6 = sld [smem:[#allocation7_spill]]  ;;  %s820_s9 = smov %s578_s10 }
  0xdf   : > { %s821_s10 = smov %s582_s11  ;;  %s822_s11 = smov %s727_s24 }
  0xe0   : > { %s823_s13 = smov %s602_s16  ;;  %s824_s15 = smov %s828_s20 }
  0xe1   : > { %s826_s17 = smov %s836_s22  ;;  %15 = sbr.rel (!%p13_p8) target bundleno = 6 (0x6), region = 84 }
  0xe4   : > { %s825_s16 = smov %s819_s6 }
  0xe8   :  { %294 = vsyncpa [#allocation3], 1 }
  0xe9   :  { %296 = vsyncpa [#allocation3 + $0x1], 1 }

</bundles_post_ra>
